<compile_context>
chip_gen: v5e
topology: v5e:2x2
jax: 0.10.0
libtpu: 0.0.40
codegen_flags: <defaults>
</compile_context>

<pallas_src>
import functools

import numpy as np
import jax
import jax.numpy as jnp
from jax import lax
from jax.experimental import pallas as pl
from jax.experimental.pallas import tpu as pltpu


# --------------------------------------------------------------------------- helpers
def _round_up(x, m):
    return ((x + m - 1) // m) * m


def _cdiv(a, b):
    return (a + b - 1) // b


def _same_pads(k, d):
    """PyTorch padding='same' (stride 1): extra padding goes on the high side."""
    total = d * (k - 1)
    return total // 2, total - total // 2


def _tpu_budget():
    """(lane alignment for Cout tiles, physical VMEM bytes per TensorCore)."""
    vmem_bytes = 64 << 20          # conservative default (v7x: 64 MiB / core)
    lane_align = 128               # v5e MXU is 4x128x128
    try:
        vmem_bytes = int(pltpu.get_tpu_info().vmem_capacity_bytes)
    except Exception:
        pass
    try:
        kind = jax.devices()[0].device_kind.lower()
        if any(t in kind for t in ("v6", "v7", "trillium")):
            lane_align = 256       # 2x256x256 MXU: keep the output dim 256-wide
        if "v7" in kind:
            vmem_bytes = min(vmem_bytes, 64 << 20)
    except Exception:
        pass
    return lane_align, vmem_bytes


def _vmem_limit(need_bytes, vmem_bytes):
    """Scoped-VMEM limit: generous headroom over our estimate, capped below physical."""
    return int(min(max(need_bytes * 3 // 2 + (4 << 20), 32 << 20), vmem_bytes * 7 // 8))


def _fold_bn(gamma, beta, running_mean, running_var, eps):
    inv_std = 1.0 / jnp.sqrt(running_var.astype(jnp.float32) + eps)
    scale = gamma.astype(jnp.float32) * inv_std
    shift = beta.astype(jnp.float32) - running_mean.astype(jnp.float32) * scale
    return scale, shift


# --------------------------------------------------------------------------- kernels
def _aspp_fullk_kernel(x_ref, w_ref, shift_ref, o_ref):
    """No K grid axis: whole (K_pad, Cout_pad) weight resident in VMEM, one matmul per
    M tile, BN shift + ReLU fused, bf16 store. x_ref: (TM, K_pad)."""
    y = jnp.dot(x_ref[...], w_ref[...], preferred_element_type=jnp.float32)
    o_ref[...] = jnp.maximum(y + shift_ref[...], 0.0).astype(o_ref.dtype)


def _aspp_tiledk_kernel(x_ref, w_ref, shift_ref, o_ref, acc_ref):
    """Fallback: grid = (batch, M tile, K chunk); f32 VMEM accumulator, reduction last."""
    k = pl.program_id(2)

    @pl.when(k == 0)
    def _init():
        acc_ref[...] = jnp.zeros_like(acc_ref)

    acc_ref[...] += jnp.dot(x_ref[...], w_ref[...], preferred_element_type=jnp.float32)

    @pl.when(k == pl.num_programs(2) - 1)
    def _finalize():
        o_ref[...] = jnp.maximum(acc_ref[...] + shift_ref[...], 0.0).astype(o_ref.dtype)


def _aspp_tap_kernel(x_ref, w_ref, shift_ref, o_ref, acc_ref, *, tap_offsets, m_rows):
    """Large-Cin path: grid = (batch, Cin chunk). x_ref holds the whole padded image for
    one batch, flattened to (rows, TCin); each conv tap is a constant row offset, so the
    tap gather is a static (possibly sublane-unaligned) VMEM slice feeding one big MXU
    matmul per tap. No im2col in HBM."""
    c = pl.program_id(1)

    @pl.when(c == 0)
    def _init():
        acc_ref[...] = jnp.zeros_like(acc_ref)

    for t, off in enumerate(tap_offsets):
        acc_ref[...] += jnp.dot(x_ref[pl.ds(off, m_rows), :], w_ref[t],
                                preferred_element_type=jnp.float32)

    @pl.when(c == pl.num_programs(1) - 1)
    def _finalize():
        o_ref[...] = jnp.maximum(acc_ref[...] + shift_ref[...], 0.0).astype(o_ref.dtype)


# --------------------------------------------------------------------------- launchers
def _im2col_forward(xpad, w_hwio, shift2d, *, N, H, W, Cin, Cout, Cout_pad,
                    KH, KW, dilation, vmem_bytes, out_dtype):
    """Small/medium Cin (or VMEM fallback): wrapper-side im2col + lane-dense matmul."""
    taps = []
    for kh in range(KH):
        for kw in range(KW):
            taps.append(lax.slice(
                xpad,
                (0, kh * dilation, kw * dilation, 0),
                (N, kh * dilation + H, kw * dilation + W, Cin)))
    K = KH * KW * Cin
    M = H * W
    xcol = jnp.stack(taps, axis=3).reshape(N, M, K)

    K_pad = _round_up(K, 128)
    w2d = jnp.pad(w_hwio.reshape(K, Cout),
                  ((0, K_pad - K), (0, Cout_pad - Cout))).astype(xcol.dtype)
    w_bytes = K_pad * Cout_pad * 2

    budget = min(int(vmem_bytes * 0.45), 40 << 20)
    full_k = w_bytes <= (6 << 20)           # drop the K grid axis when W fits in VMEM

    if full_k:
        per_row = 2 * K_pad * 2 + 2 * Cout_pad * 2                 # x + out (x2 buffers)
        tm_max = max(256, (budget - 2 * w_bytes) // per_row)
    else:
        TK = max(tk for tk in (2048, 1024, 512, 256, 128) if K_pad % tk == 0)
        per_row = 2 * TK * 2 + 2 * Cout_pad * 2 + Cout_pad * 4     # x + out + f32 acc
        tm_max = max(256, (budget - 2 * TK * Cout_pad * 2) // per_row)
    tm_max = int(min(tm_max, 4096))

    n_m = max(1, _cdiv(M, tm_max))
    if N == 1 and n_m == 1 and M >= 16:
        n_m = 2                              # keep both v7x TensorCores busy
    TM = _round_up(_cdiv(M, n_m), 8)
    M_pad = n_m * TM
    xcol = jnp.pad(xcol, ((0, 0), (0, M_pad - M), (0, K_pad - K)))

    cost = pl.CostEstimate(
        flops=2 * N * M * K * Cout,
        transcendentals=0,
        bytes_accessed=int(xcol.size * xcol.dtype.itemsize
                           + w2d.size * w2d.dtype.itemsize
                           + N * M_pad * Cout_pad * np.dtype(out_dtype).itemsize))

    if full_k:
        need = 2 * TM * K_pad * 2 + 2 * w_bytes + 2 * TM * Cout_pad * 2
        out = pl.pallas_call(
            _aspp_fullk_kernel,
            out_shape=jax.ShapeDtypeStruct((N, M_pad, Cout_pad), out_dtype),
            grid_spec=pltpu.PrefetchScalarGridSpec(
                num_scalar_prefetch=0,
                grid=(N, n_m),
                in_specs=[
                    pl.BlockSpec((pl.Squeezed(), TM, K_pad), lambda n, m: (n, m, 0)),
                    pl.BlockSpec((K_pad, Cout_pad), lambda n, m: (0, 0)),
                    pl.BlockSpec((1, Cout_pad), lambda n, m: (0, 0)),
                ],
                out_specs=pl.BlockSpec((pl.Squeezed(), TM, Cout_pad),
                                       lambda n, m: (n, m, 0)),
            ),
            compiler_params=pltpu.CompilerParams(
                dimension_semantics=("parallel", "parallel"),
                vmem_limit_bytes=_vmem_limit(need, vmem_bytes)),
            cost_estimate=cost,
        )(xcol, w2d, shift2d)
    else:
        need = (2 * TM * TK * 2 + 2 * TK * Cout_pad * 2 + 2 * TM * Cout_pad * 2
                + TM * Cout_pad * 4)
        out = pl.pallas_call(
            _aspp_tiledk_kernel,
            out_shape=jax.ShapeDtypeStruct((N, M_pad, Cout_pad), out_dtype),
            grid_spec=pltpu.PrefetchScalarGridSpec(
                num_scalar_prefetch=0,
                grid=(N, n_m, K_pad // TK),
                in_specs=[
                    pl.BlockSpec((pl.Squeezed(), TM, TK), lambda n, m, k: (n, m, k)),
                    pl.BlockSpec((TK, Cout_pad), lambda n, m, k: (k, 0)),
                    pl.BlockSpec((1, Cout_pad), lambda n, m, k: (0, 0)),
                ],
                out_specs=pl.BlockSpec((pl.Squeezed(), TM, Cout_pad),
                                       lambda n, m, k: (n, m, 0)),
                scratch_shapes=[pltpu.VMEM((TM, Cout_pad), jnp.float32)],
            ),
            compiler_params=pltpu.CompilerParams(
                dimension_semantics=("parallel", "parallel", "arbitrary"),
                vmem_limit_bytes=_vmem_limit(need, vmem_bytes)),
            cost_estimate=cost,
        )(xcol, w2d, shift2d)

    out = out[:, :M, :Cout].reshape(N, H, W, Cout)
    return jnp.transpose(out, (0, 3, 1, 2))


def _tap_forward(xpad, w_hwio, shift2d, *, N, H, W, Cin, Cout, Cout_pad,
                 KH, KW, dilation, Hp, Wp, vmem_bytes, out_dtype):
    """Large-Cin path: in-kernel tap gather (no im2col HBM amplification).
    Returns None if the working set does not fit the VMEM budget."""
    Cin_pad = _round_up(Cin, 128)
    Mout = H * Wp                              # includes (Wp - W) junk columns per row
    Mout_pad = _round_up(Mout, 8)
    max_off = (KH - 1) * dilation * Wp + (KW - 1) * dilation
    Lrows = _round_up(max_off + Mout_pad, 8)   # >= Hp*Wp, covers every tap slice

    need = None
    for TCin in (512, 256, 128):               # bigger chunk => less f32-acc RMW per flop
        if Cin_pad % TCin:
            continue
        need = (2 * Lrows * TCin * 2                   # x block (double buffered)
                + 2 * KH * KW * TCin * Cout_pad * 2    # weight block
                + 2 * Mout_pad * Cout_pad * 2          # bf16 output block
                + Mout_pad * Cout_pad * 4              # f32 accumulator
                + 2 * Cout_pad * 4)
        if need <= int(vmem_bytes * 0.55):
            break
    else:
        return None

    xflat = xpad.reshape(N, Hp * Wp, Cin)
    xflat = jnp.pad(xflat, ((0, 0), (0, Lrows - Hp * Wp), (0, Cin_pad - Cin)))
    w3 = jnp.pad(w_hwio.reshape(KH * KW, Cin, Cout),
                 ((0, 0), (0, Cin_pad - Cin), (0, Cout_pad - Cout))).astype(xflat.dtype)
    tap_offsets = tuple(kh * dilation * Wp + kw * dilation
                        for kh in range(KH) for kw in range(KW))

    cost = pl.CostEstimate(
        flops=2 * N * H * W * KH * KW * Cin * Cout,
        transcendentals=0,
        bytes_accessed=int(xflat.size * xflat.dtype.itemsize
                           + w3.size * w3.dtype.itemsize
                           + N * Mout_pad * Cout_pad * np.dtype(out_dtype).itemsize))

    out = pl.pallas_call(
        functools.partial(_aspp_tap_kernel, tap_offsets=tap_offsets, m_rows=Mout_pad),
        out_shape=jax.ShapeDtypeStruct((N, Mout_pad, Cout_pad), out_dtype),
        grid_spec=pltpu.PrefetchScalarGridSpec(
            num_scalar_prefetch=0,
            grid=(N, Cin_pad // TCin),
            in_specs=[
                pl.BlockSpec((pl.Squeezed(), Lrows, TCin), lambda n, c: (n, 0, c)),
                pl.BlockSpec((KH * KW, TCin, Cout_pad), lambda n, c: (0, c, 0)),
                pl.BlockSpec((1, Cout_pad), lambda n, c: (0, 0)),
            ],
            out_specs=pl.BlockSpec((pl.Squeezed(), Mout_pad, Cout_pad),
                                   lambda n, c: (n, 0, 0)),
            scratch_shapes=[pltpu.VMEM((Mout_pad, Cout_pad), jnp.float32)],
        ),
        compiler_params=pltpu.CompilerParams(
            dimension_semantics=("parallel", "arbitrary"),
            vmem_limit_bytes=_vmem_limit(need, vmem_bytes)),
        cost_estimate=cost,
    )(xflat, w3, shift2d)

    out = out[:, :Mout, :Cout].reshape(N, H, Wp, Cout)[:, :, :W, :]
    return jnp.transpose(out, (0, 3, 1, 2))


# --------------------------------------------------------------------------- entry point
def aspp_conv_forward(x_nchw, weight_oihw, gamma, beta, running_mean, running_var,
                      *, dilation=1, eps=1e-5,
                      compute_dtype=jnp.bfloat16, out_dtype=jnp.bfloat16):
    """ASPPConv.forward: Conv2d(padding='same', stride=1, bias=False) -> BN(eval) -> ReLU.
    Returns NCHW in `out_dtype` (bf16 by default to halve output HBM writeback)."""
    N, Cin, H, W = x_nchw.shape
    Cout, Cin_w, KH, KW = weight_oihw.shape
    assert Cin_w == Cin

    lane_align, vmem_bytes = _tpu_budget()
    Cout_pad = _round_up(Cout, lane_align)

    # Fold BatchNorm (inference) into a per-channel scale on W and a shift.
    scale, shift = _fold_bn(gamma, beta, running_mean, running_var, eps)
    shift2d = jnp.pad(shift.reshape(1, Cout), ((0, 0), (0, Cout_pad - Cout)))

    # NCHW -> NHWC + 'same' padding (extra on the high side, matching PyTorch).
    ph_lo, ph_hi = _same_pads(KH, dilation)
    pw_lo, pw_hi = _same_pads(KW, dilation)
    x_nhwc = jnp.transpose(x_nchw, (0, 2, 3, 1))
    xpad = jnp.pad(x_nhwc, ((0, 0), (ph_lo, ph_hi), (pw_lo, pw_hi), (0, 0))
                   ).astype(compute_dtype)
    Hp, Wp = H + ph_lo + ph_hi, W + pw_lo + pw_hi

    # HWIO weights with the BN scale folded in (still f32; cast to bf16 per path).
    w_hwio = (jnp.transpose(weight_oihw.astype(jnp.float32), (2, 3, 1, 0))
              * scale[None, None, None, :])

    common = dict(N=N, H=H, W=W, Cin=Cin, Cout=Cout, Cout_pad=Cout_pad,
                  KH=KH, KW=KW, dilation=dilation,
                  vmem_bytes=vmem_bytes, out_dtype=out_dtype)

    if Cin >= 192:
        out = _tap_forward(xpad, w_hwio, shift2d, Hp=Hp, Wp=Wp, **common)
        if out is not None:
            return out
    return _im2col_forward(xpad, w_hwio, shift2d, **common)


# --------------------------------------------------------------------------- self-test
def _run_case(key, N, Cin, H, W, Cout, Ksz, dil, wscale, tol_bf, tol_f32):
    eps = 1e-5
    k1, k2, k3, k4, k5, k6 = jax.random.split(key, 6)
    x = jax.random.normal(k1, (N, Cin, H, W), jnp.float32)
    weight = jax.random.normal(k2, (Cout, Cin, Ksz, Ksz), jnp.float32) * wscale
    gamma = 1.0 + 0.1 * jax.random.normal(k3, (Cout,), jnp.float32)
    beta = 0.1 * jax.random.normal(k4, (Cout,), jnp.float32)
    mean = 0.1 * jax.random.normal(k5, (Cout,), jnp.float32)
    var = jax.nn.softplus(jax.random.normal(k6, (Cout,), jnp.float32)) + 0.5

    out = aspp_conv_forward(x, weight, gamma, beta, mean, var, dilation=dil, eps=eps)
    out = jax.block_until_ready(out)
    assert out.shape == (N, Cout, H, W)
    out32 = out.astype(jnp.float32)

    inv = 1.0 / jnp.sqrt(var + eps)
    scale = gamma * inv
    shift = beta - mean * scale
    pads = [_same_pads(Ksz, dil), _same_pads(Ksz, dil)]

    # Reference 1: identical bf16 operand cast + bf16 output rounding (tight check).
    w_scaled = weight * scale[:, None, None, None]
    conv_bf = lax.conv_general_dilated(
        x.astype(jnp.bfloat16), w_scaled.astype(jnp.bfloat16),
        window_strides=(1, 1), padding=pads, rhs_dilation=(dil, dil),
        dimension_numbers=("NCHW", "OIHW", "NCHW"),
        preferred_element_type=jnp.float32)
    ref_bf = jnp.maximum(conv_bf + shift[None, :, None, None], 0.0
                         ).astype(jnp.bfloat16).astype(jnp.float32)
    err_bf = float(jnp.max(jnp.abs(out32 - ref_bf)))
    assert jnp.allclose(out32, ref_bf, atol=tol_bf, rtol=tol_bf), err_bf

    # Reference 2: full-f32 PyTorch semantics (loose: bf16 operand/output rounding).
    conv_f32 = lax.conv_general_dilated(
        x, weight, window_strides=(1, 1), padding=pads, rhs_dilation=(dil, dil),
        dimension_numbers=("NCHW", "OIHW", "NCHW"))
    ref_f32 = jnp.maximum(conv_f32 * scale[None, :, None, None]
                          + shift[None, :, None, None], 0.0)
    err_f32 = float(jnp.max(jnp.abs(out32 - ref_f32)))
    assert jnp.allclose(out32, ref_f32, atol=tol_f32, rtol=tol_f32), err_f32


if __name__ == "__main__":
    key = jax.random.PRNGKey(0)
    k_small, k_big = jax.random.split(key)

    # Small-Cin path (wrapper im2col, full-K kernel, no reduction grid axis).
    _run_case(k_small, N=2, Cin=4, H=16, W=16, Cout=32, Ksz=3, dil=2,
              wscale=0.1, tol_bf=1.5e-2, tol_f32=5e-2)

    # Large-Cin path (in-kernel tap gather, Cin-chunk reduction, no im2col in HBM).
    _run_case(k_big, N=1, Cin=256, H=16, W=16, Cout=64, Ksz=3, dil=2,
              wscale=0.05, tol_bf=3e-2, tol_f32=1e-1)

    print("KERNEL_OK")
</pallas_src>

<mosaic_0001>
module attributes {stable_mosaic.version = 11 : i64} {
  func.func @_aspp_fullk_kernel(%arg0: i32, %arg1: i32, %arg2: memref<1x256x128xbf16, #tpu.memory_space<vmem>>, %arg3: memref<128x128xbf16, #tpu.memory_space<vmem>>, %arg4: memref<1x128xf32, #tpu.memory_space<vmem>>, %arg5: memref<1x256x128xbf16, #tpu.memory_space<vmem>>) attributes {dimension_semantics = [#tpu.dimension_semantics<parallel>, #tpu.dimension_semantics<parallel>], iteration_bounds = array<i64: 2, 1>, scalar_prefetch = 0 : i64, scratch_operands = 0 : i64, tpu.core_type = #tpu.core_type<tc>, window_params = [{transform_indices = @transform_0, window_bounds = array<i64: 1, 256, 128>}, {pipeline_mode = #tpu.pipeline_mode<synchronous>, transform_indices = @transform_1, window_bounds = array<i64: 128, 128>}, {pipeline_mode = #tpu.pipeline_mode<synchronous>, transform_indices = @transform_2, window_bounds = array<i64: 1, 128>}, {transform_indices = @transform_3, window_bounds = array<i64: 1, 256, 128>}]} {
    %c0 = arith.constant 0 : index
    %c0_0 = arith.constant 0 : index
    %c0_1 = arith.constant 0 : index
    %0 = vector.load %arg2[%c0, %c0_0, %c0_1] : memref<1x256x128xbf16, #tpu.memory_space<vmem>>, vector<1x256x128xbf16>
    %1 = vector.shape_cast %0 : vector<1x256x128xbf16> to vector<256x128xbf16>
    %c0_2 = arith.constant 0 : index
    %c0_3 = arith.constant 0 : index
    %2 = vector.load %arg3[%c0_2, %c0_3] : memref<128x128xbf16, #tpu.memory_space<vmem>>, vector<128x128xbf16>
    %cst = arith.constant dense<0.000000e+00> : vector<256x128xf32>
    %3 = tpu.matmul %1, %2, %cst {dimension_numbers = #tpu.dot_dimension_numbers<[1], [0], [0], [1], [0, 0, 1, 1], [], []>} : vector<256x128xbf16>, vector<128x128xbf16>, vector<256x128xf32> -> vector<256x128xf32>
    %c0_4 = arith.constant 0 : index
    %c0_5 = arith.constant 0 : index
    %4 = vector.load %arg4[%c0_4, %c0_5] : memref<1x128xf32, #tpu.memory_space<vmem>>, vector<1x128xf32>
    %5 = vector.broadcast %4 : vector<1x128xf32> to vector<256x128xf32>
    %6 = arith.addf %3, %5 : vector<256x128xf32>
    %cst_6 = arith.constant 0.000000e+00 : f32
    %7 = vector.broadcast %cst_6 : f32 to vector<256x128xf32>
    %8 = arith.maximumf %6, %7 : vector<256x128xf32>
    %9 = arith.truncf %8 : vector<256x128xf32> to vector<256x128xbf16>
    %c0_7 = arith.constant 0 : index
    %c0_8 = arith.constant 0 : index
    %c0_9 = arith.constant 0 : index
    %10 = vector.load %arg5[%c0_7, %c0_8, %c0_9] : memref<1x256x128xbf16, #tpu.memory_space<vmem>>, vector<1x256x128xbf16>
    %11 = vector.shape_cast %10 : vector<1x256x128xbf16> to vector<256x128xbf16>
    %12 = vector.shape_cast %9 : vector<256x128xbf16> to vector<1x256x128xbf16>
    tpu.vector_store %arg5[%c0_7, %c0_8, %c0_9], %12 {strides = array<i32>} : memref<1x256x128xbf16, #tpu.memory_space<vmem>>, vector<1x256x128xbf16>,
    return
  }
  func.func @transform_0(%arg0: i32, %arg1: i32) -> (i32, i32, i32) {
    %c0_i32 = arith.constant 0 : i32
    %c0_i32_0 = arith.constant 0 : i32
    return %arg0, %arg1, %c0_i32 : i32, i32, i32
  }
  func.func @transform_1(%arg0: i32, %arg1: i32) -> (i32, i32) {
    %c0_i32 = arith.constant 0 : i32
    %c0_i32_0 = arith.constant 0 : i32
    %c0_i32_1 = arith.constant 0 : i32
    return %c0_i32, %c0_i32_0 : i32, i32
  }
  func.func @transform_2(%arg0: i32, %arg1: i32) -> (i32, i32) {
    %c0_i32 = arith.constant 0 : i32
    %c0_i32_0 = arith.constant 0 : i32
    %c0_i32_1 = arith.constant 0 : i32
    return %c0_i32, %c0_i32_0 : i32, i32
  }
  func.func @transform_3(%arg0: i32, %arg1: i32) -> (i32, i32, i32) {
    %c0_i32 = arith.constant 0 : i32
    %c0_i32_0 = arith.constant 0 : i32
    return %arg0, %arg1, %c0_i32 : i32, i32, i32
  }
}

</mosaic_0001>

<bundles_post_ra>
// kernel: tpu_custom_call.1
= control target key start
LH: loop header
LB: loop body
LE: loop exit
PB: predicated region body
PF: predicated region fallthrough
CT: control target
= control target key end

     0   :  { %s1466_s0 = inlined_call_operand.hbm [shape: bf16[2,256,128], index: 0, kind: input, shape index: {}]   ;;  %s1467_s1 = inlined_call_operand.hbm [shape: bf16[128,128], index: 1, kind: input, shape index: {}]   ;;  %s1468_s2 = inlined_call_operand.vmem [shape: f32[1,128], index: 2, kind: input, shape index: {}]   ;;  %s1469_s3 = inlined_call_operand.hbm [shape: bf16[2,256,128], index: 3, kind: output, shape index: {}]  }
   0x1   :  { %1471 = sst [smem:[#allocation11_spill]] %s1467_s1 }
   0x2   :  { %8 = vsyncpa [#allocation3], 0 }
   0x3   :  { %10 = vsyncpa [#allocation3 + $0x1], 0 }
   0x4   :  { %11 = vsyncpa [#allocation6], 0 }
   0x5   :  { %12 = vsyncpa [#allocation4], 0 }
   0x6   :  { %14 = vsyncpa [#allocation4 + $0x1], 0  ;;  %s1233_s12 = smov 0   ;;  %s1235_s13 = smov 0  }
   0x7   :  { %s1237_s14 = smov 0   ;;  %s1239_s15 = smov 0  }
   0x8   :  { %s1241_s16 = smov 0   ;;  %s1243_s17 = smov 0  }
   0x9 LB: > { %s724_s18 = sadd.s32 4294967295, %s1206_s17   ;;  %s725_s19 = sadd.s32 4294967294, %s1206_s17   ;;  %s1206_s17 = sphi %s1243_s17, %s20_s17   ;;  %s1202_s16 = sphi %s1241_s16, %s1485_s16   ;;  %s1198_s15 = sphi %s1239_s15, %s1484_s15   ;;  %s1194_s14 = sphi %s1237_s14, %s1483_s14   ;;  %s1190_s13 = sphi %s1235_s13, %s1482_s13   ;;  %s1186_s12 = sphi %s1233_s12, %s1481_s12  }
   0xa   : > { %p54_p0 = scmp.ne.s32.totalorder %s1190_s13, %s1186_s12  ;;  %p1267_p1 = scmp.eq.s32.totalorder %s724_s18, 0 }
   0xb   : > { %p1271_p2 = scmp.eq.s32.totalorder %s724_s18, 1  ;;  %p128_p3 = scmp.eq.s32.totalorder %s725_s19, 1 }
   0xc   : > { %p1277_p4 = por %p1267_p1, %p54_p0  ;;  %p726_p5 = scmp.ge.s32.totalorder %s1206_s17, 1 }
   0xd   : > { %p1282_p6 = por %p128_p3, %p54_p0  ;;  %p135_p7 = scmp.lt.s32.totalorder %s1206_s17, 3 }
   0xe   : > { %s1476_s1 = sld [smem:[#allocation11_spill]]  ;;  %s1208_s28 = smov [#allocation5]  }
   0xf   : > { %p1290_p8 = pnand %p726_p5, %p135_p7  ;;  %s148_s29 = sshll.u32 %s1208_s28, 4  ;;  %s149_s29 = int_to_ptr.vmem [resolvable:$true] %s148_s29 }
  0x10   : > { %p728_p11 = scmp.ge.s32.totalorder %s1206_s17, 2  ;;  %s1470_s30 = smov 64  }
  0x11   : > { %p990_p9 = pneg %p1290_p8  ;;  %s1210_s4 = smov 4  }
  0x12   : > { %s32_s5 = sadd.s32 1, %s1202_s16  ;;  %s41_s6 = sadd.s32 1, %s1194_s14 }
  0x13   : > { %p991_p10 = pnand %p990_p9, %p1267_p1  ;;  %p34_p12 = scmp.ge.s32.totalorder %s32_s5, 2 }
  0x14   : > { %s146_s26 = sshll.u32 %s1476_s1, 4  ;;  %p48_p13 = scmp.ne.s32.totalorder %s1194_s14, %s1190_s13  ;;  %s147_s26 = int_to_ptr.hbm [resolvable:$true] %s146_s26 }
  0x15   : > { %993 = dma.hbm_to_vmem [thread:$0]  (!%p991_p10), %s147_s26, 1024, %s149_s29, [#allocation6], %s1470_s30, %s1470_s30, %s1210_s4  }
  0x16   : > { %p49_p0 = scmp.eq.s32.totalorder %s1206_s17, 0  ;;  %s1487_s5 = smov (%p34_p12, %s32_s5), 0 }
  0x17   : > { %p1315_p5 = por %p1271_p2, %p48_p13  ;;  %s36_s9 = ssub.s32 %s1202_s16, %s1487_s5 }
  0x18   : > { %p1309_p3 = por %p49_p0, %p48_p13  ;;  %p1003_p7 = scmp.lt.s32.totalorder %s1206_s17, 2 }
  0x19   : > { %p39_p9 = scmp.eq.s32.totalorder %s36_s9, 0  ;;  %s165_s10 = sand.u32 1, %s1194_s14  }
  0x1a   : > { %s729_s11 = sshll.u32 %s165_s10, 7  ;;  %s837_s19 = sshll.u32 %s1202_s16, 7 }
  0x1b   : > { %s1324_s18 = scalar_select %p39_p9, %s1194_s14, %s41_s6  }
  0x1c   : > { %s176_s26 = scalar_lea.hbm %s1466_s0, %s837_s19  ;;  %s169_s28 = scalar_lea.vmem [#allocation2], %s729_s11 }
  0x1d   : > { %s179_s29 = sshll.u32 %s169_s28, 4  ;;  %s177_s21 = sshll.u32 %s176_s26, 4  ;;  %s180_s29 = int_to_ptr.vmem [resolvable:$true] %s179_s29  ;;  %s178_s21 = int_to_ptr.hbm [resolvable:$true] %s177_s21 }
  0x1e   : > { %p995_p2 = pnand %p1003_p7, %p1309_p3  ;;  %s166_s30 = scalar_lea.sflag [#allocation3], %s165_s10 }
  0x1f   : > { %s1480_s1 = smov 64   ;;  %191 = sbr.rel (%p1290_p8) target bundleno = 271 (0x10f), region = 32 }
  0x20   : > { %997 = dma.hbm_to_vmem [thread:$0]  (!%p995_p2), %s178_s21, 2048, %s180_s29, %s166_s30, %s1480_s1, %s1480_s1, %s1210_s4  }
  0x21   : > { %s1338_s6 = sand.u32 (!%p1290_p8), 1, %s1190_s13  }
  0x22   : > { %s733_s9 = sshll.u32 (!%p1290_p8), %s1338_s6, 7  ;;  %s194_s11 = scalar_lea.sflag (!%p1290_p8), [#allocation3], %s1338_s6 }
  0x23   : > { %s1344_s7 = scalar_lea.vmem (!%p1290_p8), [#allocation2], %s733_s9 }
  0x24   : > { %1173 = dma.done.wait (%p1277_p4), %s194_s11, 2048  }
  0x25   : > { %1175 = vsyncadd (%p1277_p4), %s194_s11, 4294965248 }
  0x26   : > { %1177 = dma.done.wait (%p1267_p1), [#allocation6], 1024  }
  0x27   : > { %1179 = vsyncadd (%p1267_p1), [#allocation6], 4294966272  ;;  %v861_v0 = vld [vmem:[#allocation5 + $0x38] sm:$0xff]  ;;  %v860_v1 = vld [vmem:[#allocation5 + $0x30] sm:$0xff]  ;;  %s1383_s22 = scalar_lea.vmem [#allocation7], %s733_s9  ;;  %s862_s27 = sshll.u32 %s1198_s15, 7 }
  0x28   : > { %424 = vmatpush.bf16.msra.mxu0 %v861_v0  ;;  %958 = vmatpush.bf16.msra.mxu1 %v861_v0  ;;  %v859_v2 = vld [vmem:[#allocation5 + $0x28] sm:$0xff]  ;;  %v858_v3 = vld [vmem:[#allocation5 + $0x20] sm:$0xff]  ;;  %v857_v4 = vld [vmem:[#allocation5 + $0x18] sm:$0xff]  ;;  %s623_s10 = scalar_lea.hbm %s1469_s3, %s862_s27  ;;  %s624_s15 = sshll.u32 %s1383_s22, 4  ;;  %s625_s15 = int_to_ptr.vmem [resolvable:$true] %s624_s15 }
  0x29   : > { %959 = vmatpush.bf16.msra.mxu2 %v861_v0  ;;  %960 = vmatpush.bf16.msra.mxu3 %v861_v0  ;;  %v856_v5 = vld [vmem:[#allocation5 + $0x10] sm:$0xff]  ;;  %v855_v6 = vld [vmem:[#allocation5 + $0x8] sm:$0xff]  ;;  %v854_v7 = vld [vmem:[#allocation5] sm:$0xff]  ;;  %s626_s19 = sshll.u32 %s623_s10, 4  ;;  %s610_s24 = scalar_lea.sflag [#allocation4], %s1338_s6  ;;  %s627_s19 = int_to_ptr.hbm [resolvable:$true] %s626_s19 }
  0x2a   : > { %v838_v8 = vld [vmem:[%s1344_s7] sm:$0xff]  ;;  %v839_v12 = vld [vmem:[%s1344_s7 + $0x8] sm:$0xff]  ;;  %v840_v16 = vld [vmem:[%s1344_s7 + $0x10] sm:$0xff]  ;;  %s1134_s25 = sshra.s32 %s627_s19, 4  ;;  %s1140_s21 = scalar_lea.hbm %s1469_s3, 256  ;;  %s1135_s25 = int_to_ptr.hbm [resolvable:$true] %s1134_s25 }
  0x2b   : > { %v842_v9 = vld [vmem:[%s1344_s7 + $0x20] sm:$0xff]  ;;  %v843_v13 = vld [vmem:[%s1344_s7 + $0x28] sm:$0xff]  ;;  %v844_v17 = vld [vmem:[%s1344_s7 + $0x30] sm:$0xff]  ;;  %s1136_s26 = scalar_lea.hbm %s1135_s25, 128  ;;  %p1141_p10 = scmp.lt.s32.totalorder %s1135_s25, %s1469_s3 }
  0x2c   : > { %425 = vmatpush.bf16.msra.mxu0 %v860_v1  ;;  %961 = vmatpush.bf16.msra.mxu1 %v860_v1  ;;  %v846_v10 = vld [vmem:[%s1344_s7 + $0x40] sm:$0xff]  ;;  %v847_v14 = vld [vmem:[%s1344_s7 + $0x48] sm:$0xff]  ;;  %v848_v18 = vld [vmem:[%s1344_s7 + $0x50] sm:$0xff]  ;;  %p1137_p1 = scmp.ne.s32.totalorder %s1135_s25, %s1136_s26  ;;  %p1142_p12 = scmp.lt.s32.totalorder %s1140_s21, %s1136_s26 }
  0x2d   : > { %962 = vmatpush.bf16.msra.mxu2 %v860_v1  ;;  %963 = vmatpush.bf16.msra.mxu3 %v860_v1  ;;  %v850_v11 = vld [vmem:[%s1344_s7 + $0x60] sm:$0xff]  ;;  %v851_v15 = vld [vmem:[%s1344_s7 + $0x68] sm:$0xff]  ;;  %v852_v19 = vld [vmem:[%s1344_s7 + $0x70] sm:$0xff] }
  0x2e   : > { %v841_v20 = vld [vmem:[%s1344_s7 + $0x18] sm:$0xff]  ;;  %v1373_v26 = vld [vmem:[%s1468_s2] ss:$0 sm:$0xff]  ;;  %p1138_p4 = pnand %p1137_p1, %p1315_p5  ;;  %p1143_p13 = por %p1142_p12, %p1141_p10 }
  0x2f   : > { %v845_v21 = vld [vmem:[%s1344_s7 + $0x38] sm:$0xff] }
  0x30   : > { %426 = vmatpush.bf16.msra.mxu0 %v859_v2  ;;  %964 = vmatpush.bf16.msra.mxu1 %v859_v2  ;;  %v849_v22 = vld [vmem:[%s1344_s7 + $0x58] sm:$0xff]  ;;  %p1139_p8 = pneg %p1138_p4 }
  0x31   : > { %965 = vmatpush.bf16.msra.mxu2 %v859_v2  ;;  %966 = vmatpush.bf16.msra.mxu3 %v859_v2  ;;  %v853_v23 = vld [vmem:[%s1344_s7 + $0x78] sm:$0xff] }
  0x32   : > { %p1144_p0 = pnand %p1143_p13, %p1139_p8 }
  0x34   : > { %427 = vmatpush.bf16.msra.mxu0 %v858_v3  ;;  %967 = vmatpush.bf16.msra.mxu1 %v858_v3 }
  0x35   : > { %968 = vmatpush.bf16.msra.mxu2 %v858_v3  ;;  %969 = vmatpush.bf16.msra.mxu3 %v858_v3 }
  0x38   : > { %428 = vmatpush.bf16.msra.mxu0 %v857_v4  ;;  %970 = vmatpush.bf16.msra.mxu1 %v857_v4 }
  0x39   : > { %971 = vmatpush.bf16.msra.mxu2 %v857_v4  ;;  %972 = vmatpush.bf16.msra.mxu3 %v857_v4 }
  0x3c   : > { %429 = vmatpush.bf16.msra.mxu0 %v856_v5  ;;  %973 = vmatpush.bf16.msra.mxu1 %v856_v5 }
  0x3d   : > { %974 = vmatpush.bf16.msra.mxu2 %v856_v5  ;;  %975 = vmatpush.bf16.msra.mxu3 %v856_v5 }
  0x40   : > { %430 = vmatpush.bf16.msra.mxu0 %v855_v6  ;;  %976 = vmatpush.bf16.msra.mxu1 %v855_v6 }
  0x41   : > { %977 = vmatpush.bf16.msra.mxu2 %v855_v6  ;;  %978 = vmatpush.bf16.msra.mxu3 %v855_v6 }
  0x44   : > { %431 = vmatpush.bf16.msra.mxu0 %v854_v7  ;;  %979 = vmatpush.bf16.msra.mxu1 %v854_v7 }
  0x45   : > { %980 = vmatpush.bf16.msra.mxu2 %v854_v7  ;;  %981 = vmatpush.bf16.msra.mxu3 %v854_v7 }
  0x47   : > { %432 = vmatmul.bf16.vlgmr.msra.gmra.mxu0 %v838_v8  ;;  %452 = vmatmul.bf16.vlgmr.msra.gmra.mxu1 %v842_v9 }
  0x48   : > { %472 = vmatmul.bf16.vlgmr.msra.gmra.mxu2 %v846_v10  ;;  %492 = vmatmul.bf16.vlgmr.msra.gmra.mxu3 %v850_v11 }
  0x57   : > { %437 = vmatmul.bf16.gmra.mxu0 %v839_v12  ;;  %457 = vmatmul.bf16.gmra.mxu1 %v843_v13 }
  0x58   : > { %477 = vmatmul.bf16.gmra.mxu2 %v847_v14  ;;  %497 = vmatmul.bf16.gmra.mxu3 %v851_v15 }
  0x67   : > { %442 = vmatmul.bf16.gmra.mxu0 %v840_v16  ;;  %462 = vmatmul.bf16.gmra.mxu1 %v844_v17 }
  0x68   : > { %482 = vmatmul.bf16.gmra.mxu2 %v848_v18  ;;  %502 = vmatmul.bf16.gmra.mxu3 %v852_v19 }
  0x77   : > { %447 = vmatmul.bf16.gmra.mxu0 %v841_v20  ;;  %467 = vmatmul.bf16.gmra.mxu1 %v845_v21 }
  0x78   : > { %487 = vmatmul.bf16.gmra.mxu2 %v849_v22  ;;  %507 = vmatmul.bf16.gmra.mxu3 %v853_v23 }
  0xc4   : > { %v433_v24 = vpop.f32.mrf.mxu0  ;;  %v453_v25 = vpop.f32.mrf.mxu1 }
  0xc5   : > { %v434_v27 = vadd.f32 %v1373_v26, %v433_v24  ;;  %v454_v28 = vadd.f32 %v1373_v26, %v453_v25 }
  0xc7   : > { %v513_v35 = vmax.f32 %v434_v27, 0.0  ;;  %v521_v36 = vmax.f32 %v454_v28, 0.0 }
  0xcb   : > { %v473_v29 = vpop.f32.mrf.mxu2  ;;  %v493_v30 = vpop.f32.mrf.mxu3 }
  0xcc   : > { %v435_v31 = vpop.f32.mrf.mxu0  ;;  %v455_v32 = vpop.f32.mrf.mxu1  ;;  %v474_v41 = vadd.f32 %v1373_v26, %v473_v29  ;;  %v494_v42 = vadd.f32 %v1373_v26, %v493_v30 }
  0xcd   : > { %v436_v33 = vadd.f32 %v1373_v26, %v435_v31  ;;  %v456_v34 = vadd.f32 %v1373_v26, %v455_v32 }
  0xce   : > { %v529_v49 = vmax.f32 %v474_v41, 0.0  ;;  %v537_v50 = vmax.f32 %v494_v42, 0.0 }
  0xcf   : > { %v514_v37 = vmax.f32 %v436_v33, 0.0  ;;  %v522_v38 = vmax.f32 %v456_v34, 0.0 }
  0xd1   : > { %v866_v39 = vpack.c.bf16 %v514_v37, %v513_v35  ;;  %v886_v40 = vpack.c.bf16 %v522_v38, %v521_v36 }
  0xd3   : > { %867 = vst [vmem:[%s1383_s22] sm:$0xff] %v866_v39   ;;  %v475_v43 = vpop.f32.mrf.mxu2  ;;  %v495_v44 = vpop.f32.mrf.mxu3 }
  0xd4   : > { %946 = vst [vmem:[%s1383_s22 + $0x20] sm:$0xff] %v886_v40   ;;  %v476_v45 = vadd.f32 %v1373_v26, %v475_v43  ;;  %v496_v46 = vadd.f32 %v1373_v26, %v495_v44  ;;  %v438_v47 = vpop.f32.mrf.mxu0  ;;  %v458_v48 = vpop.f32.mrf.mxu1 }
  0xd5   : > { %v439_v55 = vadd.f32 %v1373_v26, %v438_v47  ;;  %v459_v56 = vadd.f32 %v1373_v26, %v458_v48 }
  0xd6   : > { %v530_v51 = vmax.f32 %v476_v45, 0.0  ;;  %v538_v52 = vmax.f32 %v496_v46, 0.0 }
  0xd7   : > { %v515_v63 = vmax.f32 %v439_v55, 0.0  ;;  %v523_v0 = vmax.f32 %v459_v56, 0.0 }
  0xd8   : > { %v906_v53 = vpack.c.bf16 %v530_v51, %v529_v49  ;;  %v926_v54 = vpack.c.bf16 %v538_v52, %v537_v50 }
  0xda   : > { %950 = vst [vmem:[%s1383_s22 + $0x40] sm:$0xff] %v906_v53  }
  0xdb   : > { %954 = vst [vmem:[%s1383_s22 + $0x60] sm:$0xff] %v926_v54   ;;  %v478_v57 = vpop.f32.mrf.mxu2  ;;  %v498_v58 = vpop.f32.mrf.mxu3 }
  0xdc   : > { %v440_v59 = vpop.f32.mrf.mxu0  ;;  %v460_v60 = vpop.f32.mrf.mxu1  ;;  %v479_v5 = vadd.f32 %v1373_v26, %v478_v57  ;;  %v499_v6 = vadd.f32 %v1373_v26, %v498_v58 }
  0xdd   : > { %v441_v61 = vadd.f32 %v1373_v26, %v440_v59  ;;  %v461_v62 = vadd.f32 %v1373_v26, %v460_v60 }
  0xde   : > { %v531_v13 = vmax.f32 %v479_v5, 0.0  ;;  %v539_v14 = vmax.f32 %v499_v6, 0.0 }
  0xdf   : > { %v516_v1 = vmax.f32 %v441_v61, 0.0  ;;  %v524_v2 = vmax.f32 %v461_v62, 0.0 }
  0xe1   : > { %v871_v3 = vpack.c.bf16 %v516_v1, %v515_v63  ;;  %v891_v4 = vpack.c.bf16 %v524_v2, %v523_v0 }
  0xe3   : > { %943 = vst [vmem:[%s1383_s22 + $0x8] sm:$0xff] %v871_v3   ;;  %v480_v7 = vpop.f32.mrf.mxu2  ;;  %v500_v8 = vpop.f32.mrf.mxu3 }
  0xe4   : > { %947 = vst [vmem:[%s1383_s22 + $0x28] sm:$0xff] %v891_v4   ;;  %v481_v9 = vadd.f32 %v1373_v26, %v480_v7  ;;  %v501_v10 = vadd.f32 %v1373_v26, %v500_v8  ;;  %v443_v11 = vpop.f32.mrf.mxu0  ;;  %v463_v12 = vpop.f32.mrf.mxu1 }
  0xe5   : > { %v444_v19 = vadd.f32 %v1373_v26, %v443_v11  ;;  %v464_v20 = vadd.f32 %v1373_v26, %v463_v12 }
  0xe6   : > { %v532_v15 = vmax.f32 %v481_v9, 0.0  ;;  %v540_v16 = vmax.f32 %v501_v10, 0.0 }
  0xe7   : > { %v517_v28 = vmax.f32 %v444_v19, 0.0  ;;  %v525_v29 = vmax.f32 %v464_v20, 0.0 }
  0xe8   : > { %v911_v17 = vpack.c.bf16 %v532_v15, %v531_v13  ;;  %v931_v18 = vpack.c.bf16 %v540_v16, %v539_v14 }
  0xea   : > { %951 = vst [vmem:[%s1383_s22 + $0x48] sm:$0xff] %v911_v17  }
  0xeb   : > { %955 = vst [vmem:[%s1383_s22 + $0x68] sm:$0xff] %v931_v18   ;;  %v483_v21 = vpop.f32.mrf.mxu2  ;;  %v503_v22 = vpop.f32.mrf.mxu3 }
  0xec   : > { %v445_v23 = vpop.f32.mrf.mxu0  ;;  %v465_v24 = vpop.f32.mrf.mxu1  ;;  %v484_v34 = vadd.f32 %v1373_v26, %v483_v21  ;;  %v504_v35 = vadd.f32 %v1373_v26, %v503_v22 }
  0xed   : > { %v446_v25 = vadd.f32 %v1373_v26, %v445_v23  ;;  %v466_v27 = vadd.f32 %v1373_v26, %v465_v24 }
  0xee   : > { %v533_v42 = vmax.f32 %v484_v34, 0.0  ;;  %v541_v43 = vmax.f32 %v504_v35, 0.0 }
  0xef   : > { %v518_v30 = vmax.f32 %v446_v25, 0.0  ;;  %v526_v31 = vmax.f32 %v466_v27, 0.0 }
  0xf1   : > { %v876_v32 = vpack.c.bf16 %v518_v30, %v517_v28  ;;  %v896_v33 = vpack.c.bf16 %v526_v31, %v525_v29 }
  0xf3   : > { %944 = vst [vmem:[%s1383_s22 + $0x10] sm:$0xff] %v876_v32   ;;  %v485_v36 = vpop.f32.mrf.mxu2  ;;  %v505_v37 = vpop.f32.mrf.mxu3 }
  0xf4   : > { %948 = vst [vmem:[%s1383_s22 + $0x30] sm:$0xff] %v896_v33   ;;  %v486_v38 = vadd.f32 %v1373_v26, %v485_v36  ;;  %v506_v39 = vadd.f32 %v1373_v26, %v505_v37  ;;  %v448_v40 = vpop.f32.mrf.mxu0  ;;  %v468_v41 = vpop.f32.mrf.mxu1 }
  0xf5   : > { %v449_v48 = vadd.f32 %v1373_v26, %v448_v40  ;;  %v469_v49 = vadd.f32 %v1373_v26, %v468_v41 }
  0xf6   : > { %v534_v44 = vmax.f32 %v486_v38, 0.0  ;;  %v542_v45 = vmax.f32 %v506_v39, 0.0 }
  0xf7   : > { %v519_v56 = vmax.f32 %v449_v48, 0.0  ;;  %v527_v57 = vmax.f32 %v469_v49, 0.0 }
  0xf8   : > { %v916_v46 = vpack.c.bf16 %v534_v44, %v533_v42  ;;  %v936_v47 = vpack.c.bf16 %v542_v45, %v541_v43 }
  0xfa   : > { %952 = vst [vmem:[%s1383_s22 + $0x50] sm:$0xff] %v916_v46  }
  0xfb   : > { %956 = vst [vmem:[%s1383_s22 + $0x70] sm:$0xff] %v936_v47   ;;  %v488_v50 = vpop.f32.mrf.mxu2  ;;  %v508_v51 = vpop.f32.mrf.mxu3 }
  0xfc   : > { %v450_v52 = vpop.f32.mrf.mxu0  ;;  %v470_v53 = vpop.f32.mrf.mxu1  ;;  %v489_v62 = vadd.f32 %v1373_v26, %v488_v50  ;;  %v509_v63 = vadd.f32 %v1373_v26, %v508_v51 }
  0xfd   : > { %v451_v54 = vadd.f32 %v1373_v26, %v450_v52  ;;  %v471_v55 = vadd.f32 %v1373_v26, %v470_v53 }
  0xfe   : > { %v535_v4 = vmax.f32 %v489_v62, 0.0  ;;  %v543_v5 = vmax.f32 %v509_v63, 0.0 }
  0xff   : > { %v520_v58 = vmax.f32 %v451_v54, 0.0  ;;  %v528_v59 = vmax.f32 %v471_v55, 0.0 }
 0x101   : > { %v881_v60 = vpack.c.bf16 %v520_v58, %v519_v56  ;;  %v901_v61 = vpack.c.bf16 %v528_v59, %v527_v57 }
 0x103   : > { %945 = vst [vmem:[%s1383_s22 + $0x18] sm:$0xff] %v881_v60   ;;  %v490_v0 = vpop.f32.mrf.mxu2  ;;  %v510_v1 = vpop.f32.mrf.mxu3 }
 0x104   : > { %949 = vst [vmem:[%s1383_s22 + $0x38] sm:$0xff] %v901_v61   ;;  %v491_v2 = vadd.f32 %v1373_v26, %v490_v0  ;;  %v511_v3 = vadd.f32 %v1373_v26, %v510_v1 }
 0x106   : > { %v536_v6 = vmax.f32 %v491_v2, 0.0  ;;  %v544_v7 = vmax.f32 %v511_v3, 0.0 }
 0x108   : > { %v921_v8 = vpack.c.bf16 %v536_v6, %v535_v4  ;;  %v941_v9 = vpack.c.bf16 %v544_v7, %v543_v5 }
 0x10a   : > { %953 = vst [vmem:[%s1383_s22 + $0x58] sm:$0xff] %v921_v8  }
 0x10b   : > { %957 = vst [vmem:[%s1383_s22 + $0x78] sm:$0xff] %v941_v9  }
 0x10c   : > { %1147 = shalt.err (!%p1144_p0)
}
 0x10d   : > { %s1211_s6 = smov 64   ;;  %s1212_s7 = smov 4  }
 0x10e   : > { %988 = dma.vmem_to_hbm [thread:$0]  (%p1315_p5), %s625_s15, 2048, %s627_s19, %s610_s24, %s1211_s6, %s1211_s6, %s1212_s7  }
 0x10f PF: > { %s641_s1 = sand.u32 1, %s1186_s12   ;;  %p999_p3 = pnand %p728_p11, %p1282_p6 }
 0x110   : > { %s642_s20 = scalar_lea.sflag [#allocation4], %s641_s1 }
 0x111   : > { %p1000_p7 = pneg %p999_p3 }
 0x113   : > { %1181 = dma.done.wait (%p1000_p7), %s642_s20, 2048  }
 0x114   : > { %1183 = vsyncadd (%p1000_p7), %s642_s20, 4294965248  ;;  %s20_s17 = sadd.s32 1, %s1206_s17   ;;  %s1481_s12 = smov %s1190_s13 }
 0x115   : > { %p17_p9 = scmp.ge.s32.totalorder %s20_s17, 4   ;;  %s1482_s13 = smov %s1194_s14 }
 0x116   : > { %s1483_s14 = smov %s1324_s18  ;;  %s1484_s15 = smov %s1202_s16 }
 0x117   : > { %s1485_s16 = smov %s1487_s5  ;;  %19 = sbr.rel (!%p17_p9) target bundleno = 9 (0x9), region = 81 }
 0x11c   :  { %648 = vsyncpa [#allocation3], 1 }
 0x11d   :  { %650 = vsyncpa [#allocation3 + $0x1], 1 }
 0x11e   :  { %651 = vsyncpa [#allocation6], 1 }
 0x11f   :  { %652 = vsyncpa [#allocation4], 1 }
 0x120   :  { %654 = vsyncpa [#allocation4 + $0x1], 1 }

</bundles_post_ra>
